<compile_context>
chip_gen: v7x
topology: tpu7x:2x2x1
jax: 0.10.0
libtpu: 0.0.40
codegen_flags: <defaults>
</compile_context>

<pallas_src>
import functools
import math

import jax
import jax.numpy as jnp
from jax.experimental import pallas as pl
from jax.experimental.pallas import tpu as pltpu


def _round_up(n, m):
    return ((n + m - 1) // m) * m


# ---------------------------------------------------------------------------
# Pallas kernel: full MelAdapter forward for one utterance per grid step.
# ---------------------------------------------------------------------------
def mel_adapter_kernel(blk_ref, cossin_ref, melfb_ref,
                       w_in_ref, b_in_ref, alpha_ref, wb_ref, bb_ref,
                       out_ref, *, n_frames, t_pad, n_freq_pad, oversample,
                       dilations):
    # ---- hoisted time iota, valid-frame mask and shift masks (time == lanes) ----
    tt = jax.lax.broadcasted_iota(jnp.int32, (1, t_pad), 1)
    valid = (tt < n_frames).astype(jnp.float32)
    shift_set = sorted({1, -1} | {s for d in dilations for s in (d, -d)})
    smask = {s: ((tt < (t_pad - s)) if s > 0 else (tt >= -s)).astype(jnp.float32)
             for s in shift_set}

    def shift_t(v, s):
        # out[:, t] = v[:, t + s], zero-filled outside [0, t_pad)
        return pltpu.roll(v, shift=(t_pad - s) % t_pad, axis=1) * smask[s]

    def conv_k3(x, w_f, b, d):
        # 'same' Conv1d, kernel 3, dilation d, all 3 taps fused into ONE matmul.
        # x: (Cin, t_pad), w_f: (Cout, 3*Cin) tap-major, b: (Cout, 1)
        stack = jnp.concatenate([shift_t(x, -d), x, shift_t(x, d)], axis=0)
        return jnp.dot(w_f, stack, preferred_element_type=jnp.float32) + b

    # ---- power STFT: rebuild overlapping frames from hop blocks, single fused
    #      (cos|sin) matmul, then |.|^2 ----
    blk = blk_ref[0]                                      # (hop, t_blk)
    t_blk = blk.shape[1]
    parts = [blk[:, :t_pad]]
    for o in range(1, oversample):
        parts.append(pltpu.roll(blk, shift=t_blk - o, axis=1)[:, :t_pad])
    frames = jnp.concatenate(parts, axis=0) if oversample > 1 else parts[0]
    re_im = jnp.dot(cossin_ref[...], frames,
                    preferred_element_type=jnp.float32)   # (2*n_freq_pad, t_pad)
    re = re_im[:n_freq_pad]
    im = re_im[n_freq_pad:]
    power = re * re + im * im                             # (n_freq_pad, t_pad)

    # ---- mel filterbank + per-utterance energy normalization (rsqrt on EUP) ----
    mel = jnp.dot(melfb_ref[...], power,
                  preferred_element_type=jnp.float32)     # (n_mels, t_pad)
    mel = mel * valid                                     # zero out padded frames
    msq = jnp.sum(mel * mel) * (1.0 / n_frames)
    scale = jnp.minimum(jax.lax.rsqrt(msq), 1e5)          # == 1 / clamp(sqrt(msq), 1e-5)
    mel = mel * scale

    # ---- input Conv1d: n_mels -> C, kernel 3, padding='same' ----
    y = conv_k3(mel, w_in_ref[...], b_in_ref[...], 1)

    # ---- ConvBlock: 3 x (PReLU -> dilated Conv1d(k=3,'same') -> residual add) ----
    # TODO(synk): ConvBlock source not included in the reference snippet; implemented
    # as 3 residual sub-layers with dilations (1, 2, 4), scalar-alpha PReLU before
    # each conv, returning only the main path (matching `x, *_ = self.conv_block(x)`).
    for l, d in enumerate(dilations):
        a = alpha_ref[l]
        h = jnp.where(y >= 0.0, y, a * y) * valid         # mask so 'same' zero-pad holds
        y = y + conv_k3(h, wb_ref[l], bb_ref[l], d)

    out_ref[0] = y[:, :n_frames]


# ---------------------------------------------------------------------------
# Constant matrices (windowed DFT + mel filterbank), channel-major.
# ---------------------------------------------------------------------------
def _dft_cossin(n_fft, n_freq, n_freq_pad):
    """Fused (cos|sin) windowed-DFT matrix: (2*n_freq_pad, n_fft), zero-padded rows."""
    n = jnp.arange(n_fft, dtype=jnp.float32)
    win = 0.5 * (1.0 - jnp.cos(2.0 * jnp.pi * n / n_fft))          # periodic Hann
    k = jnp.arange(n_freq, dtype=jnp.float32)
    ang = 2.0 * jnp.pi * k[:, None] * n[None, :] / n_fft           # (n_freq, n_fft)
    cos = win[None, :] * jnp.cos(ang)
    sin = win[None, :] * jnp.sin(ang)
    pad = ((0, n_freq_pad - n_freq), (0, 0))
    return jnp.concatenate([jnp.pad(cos, pad), jnp.pad(sin, pad)],
                           axis=0).astype(jnp.float32)


def _mel_filterbank_t(n_freq, n_freq_pad, n_mels, sample_rate):
    """torchaudio-default mel FB (HTK scale, norm=None), channel-major (n_mels, n_freq_pad)."""
    def hz_to_mel(f):
        return 2595.0 * jnp.log10(1.0 + f / 700.0)

    def mel_to_hz(m):
        return 700.0 * (10.0 ** (m / 2595.0) - 1.0)

    f_max = sample_rate / 2.0
    all_freqs = jnp.linspace(0.0, f_max, n_freq)
    m_pts = jnp.linspace(hz_to_mel(jnp.float32(0.0)),
                         hz_to_mel(jnp.float32(f_max)), n_mels + 2)
    f_pts = mel_to_hz(m_pts)
    f_diff = f_pts[1:] - f_pts[:-1]
    slopes = f_pts[None, :] - all_freqs[:, None]
    down = -slopes[:, :-2] / f_diff[:-1]
    up = slopes[:, 2:] / f_diff[1:]
    fb = jnp.clip(jnp.minimum(down, up), 0.0, None)                # (n_freq, n_mels)
    fb_t = jnp.transpose(fb, (1, 0))                               # (n_mels, n_freq)
    return jnp.pad(fb_t, ((0, 0), (0, n_freq_pad - n_freq))).astype(jnp.float32)


# ---------------------------------------------------------------------------
# Parameters (PyTorch-shaped init, then fused / channel-major re-layout).
# ---------------------------------------------------------------------------
def init_params(key, n_mels, channels):
    k1, k2, k3, k4 = jax.random.split(key, 4)
    # PyTorch layouts: Conv1d weight (Cout, Cin, K=3)
    w_in = jax.random.normal(k1, (channels, n_mels, 3), jnp.float32) / math.sqrt(3 * n_mels)
    b_in = jax.random.normal(k2, (channels,), jnp.float32) * 0.01
    wb = jax.random.normal(k3, (3, channels, channels, 3), jnp.float32) / math.sqrt(3 * channels)
    bb = jax.random.normal(k4, (3, channels), jnp.float32) * 0.01
    alpha = jnp.full((3,), 0.25, jnp.float32)                      # PReLU default init
    # Fused-tap re-layout: w_f[cout, k*Cin + cin] = w[cout, cin, k]
    # (k=0 -> x[t-d], k=1 -> x[t], k=2 -> x[t+d], matching the in-kernel stack order)
    w_in_f = jnp.transpose(w_in, (0, 2, 1)).reshape(channels, 3 * n_mels)
    wb_f = jnp.transpose(wb, (0, 1, 3, 2)).reshape(3, channels, 3 * channels)
    return dict(w_in_f=w_in_f, b_in_f=b_in.reshape(channels, 1), alpha=alpha,
                wb_f=wb_f, bb_f=bb.reshape(3, channels, 1))


# ---------------------------------------------------------------------------
# Forward wrapper
# ---------------------------------------------------------------------------
def mel_adapter_forward(x, params, *, n_mels, output_channels, ds_factor, oversample=2):
    """x: (B, 1, T) float32 waveform (PyTorch NCT). Returns (B, output_channels, n_frames)."""
    n_fft = oversample * ds_factor
    hop = ds_factor
    n_freq = n_fft // 2 + 1
    n_freq_pad = _round_up(n_freq, 8)
    pad_tot = n_fft - ds_factor
    pad_left, pad_right = pad_tot // 2, pad_tot - pad_tot // 2

    B, _, T = x.shape
    xw = x[:, 0, :]
    pad = (ds_factor - (T % ds_factor)) % ds_factor
    xp = jnp.pad(xw, ((0, 0), (pad_left, pad + pad_right)))
    Tp = xp.shape[1]
    n_blocks = Tp // hop
    n_frames = n_blocks - oversample + 1

    t_pad = _round_up(n_frames, 128)                       # lane-dense in-kernel time extent
    t_blk = _round_up(t_pad + oversample - 1, 128)

    # Non-overlapping hop-sized blocks, channel-major (hop on sublanes, time on lanes).
    # Overlapping STFT frames are rebuilt in-kernel -> no oversample-x duplicated HBM gather.
    blocks_t = jnp.transpose(xp.reshape(B, n_blocks, hop), (0, 2, 1))
    blocks_t = jnp.pad(blocks_t, ((0, 0), (0, 0), (0, t_blk - n_blocks)))

    cossin = _dft_cossin(n_fft, n_freq, n_freq_pad)
    melfb_t = _mel_filterbank_t(n_freq, n_freq_pad, n_mels, sample_rate=24000)

    kernel = functools.partial(mel_adapter_kernel, n_frames=n_frames, t_pad=t_pad,
                               n_freq_pad=n_freq_pad, oversample=oversample,
                               dilations=(1, 2, 4))

    out = pl.pallas_call(
        kernel,
        out_shape=jax.ShapeDtypeStruct((B, output_channels, n_frames), jnp.float32),
        grid_spec=pltpu.PrefetchScalarGridSpec(
            num_scalar_prefetch=0,
            grid=(B,),
            in_specs=[
                pl.BlockSpec((1, hop, t_blk), lambda b: (b, 0, 0)),
                pl.BlockSpec((2 * n_freq_pad, n_fft), lambda b: (0, 0)),
                pl.BlockSpec((n_mels, n_freq_pad), lambda b: (0, 0)),
                pl.BlockSpec((output_channels, 3 * n_mels), lambda b: (0, 0)),
                pl.BlockSpec((output_channels, 1), lambda b: (0, 0)),
                pl.BlockSpec(memory_space=pltpu.MemorySpace.SMEM),
                pl.BlockSpec((3, output_channels, 3 * output_channels),
                             lambda b: (0, 0, 0)),
                pl.BlockSpec((3, output_channels, 1), lambda b: (0, 0, 0)),
            ],
            out_specs=pl.BlockSpec((1, output_channels, n_frames), lambda b: (b, 0, 0)),
        ),
        compiler_params=pltpu.CompilerParams(
            dimension_semantics=("parallel",),
            vmem_limit_bytes=48 * 1024 * 1024),
    )(blocks_t, cossin, melfb_t,
      params["w_in_f"], params["b_in_f"], params["alpha"],
      params["wb_f"], params["bb_f"])

    # Output is already PyTorch NCT (B, C, n_frames) -- no transpose needed.
    return out


if __name__ == "__main__":
    n_mels, output_channels, ds_factor, oversample = 16, 32, 8, 2
    B, T = 2, 256

    key = jax.random.PRNGKey(0)
    kx, kp = jax.random.split(key)
    x = jax.random.normal(kx, (B, 1, T), jnp.float32)
    params = init_params(kp, n_mels, output_channels)

    out = mel_adapter_forward(x, params, n_mels=n_mels, output_channels=output_channels,
                              ds_factor=ds_factor, oversample=oversample)
    out = jax.block_until_ready(out)

    n_frames = T // ds_factor
    assert out.shape == (B, output_channels, n_frames), out.shape
    assert bool(jnp.all(jnp.isfinite(out)))
    print("KERNEL_OK")
</pallas_src>

<mosaic_0001>
module attributes {stable_mosaic.version = 11 : i64} {
  func.func @mel_adapter_kernel(%arg0: i32, %arg1: memref<1x8x256xf32, #tpu.memory_space<vmem>>, %arg2: memref<32x16xf32, #tpu.memory_space<vmem>>, %arg3: memref<16x16xf32, #tpu.memory_space<vmem>>, %arg4: memref<32x48xf32, #tpu.memory_space<vmem>>, %arg5: memref<32x1xf32, #tpu.memory_space<vmem>>, %arg6: memref<3xf32, #tpu.memory_space<smem>>, %arg7: memref<3x32x96xf32, #tpu.memory_space<vmem>>, %arg8: memref<3x32x1xf32, #tpu.memory_space<vmem>>, %arg9: memref<1x32x32xf32, #tpu.memory_space<vmem>>) attributes {dimension_semantics = [#tpu.dimension_semantics<parallel>], iteration_bounds = array<i64: 2>, scalar_prefetch = 0 : i64, scratch_operands = 0 : i64, tpu.core_type = #tpu.core_type<tc>, window_params = [{transform_indices = @transform_0, window_bounds = array<i64: 1, 8, 256>}, {pipeline_mode = #tpu.pipeline_mode<synchronous>, transform_indices = @transform_1, window_bounds = array<i64: 32, 16>}, {pipeline_mode = #tpu.pipeline_mode<synchronous>, transform_indices = @transform_2, window_bounds = array<i64: 16, 16>}, {pipeline_mode = #tpu.pipeline_mode<synchronous>, transform_indices = @transform_3, window_bounds = array<i64: 32, 48>}, {pipeline_mode = #tpu.pipeline_mode<synchronous>, transform_indices = @transform_4, window_bounds = array<i64: 32, 1>}, {transform_indices = @transform_5, window_bounds = array<i64: 3>}, {pipeline_mode = #tpu.pipeline_mode<synchronous>, transform_indices = @transform_6, window_bounds = array<i64: 3, 32, 96>}, {pipeline_mode = #tpu.pipeline_mode<synchronous>, transform_indices = @transform_7, window_bounds = array<i64: 3, 32, 1>}, {transform_indices = @transform_8, window_bounds = array<i64: 1, 32, 32>}]} {
    %0 = tpu.iota {dimensions = array<i32: 1>} : vector<1x128xi32>
    %c32_i32 = arith.constant 32 : i32
    %1 = vector.broadcast %c32_i32 : i32 to vector<1x128xi32>
    %2 = arith.cmpi slt, %0, %1 : vector<1x128xi32>
    %3 = arith.extui %2 : vector<1x128xi1> to vector<1x128xi32>
    %4 = arith.sitofp %3 : vector<1x128xi32> to vector<1x128xf32>
    %c4_i32 = arith.constant 4 : i32
    %5 = vector.broadcast %c4_i32 : i32 to vector<1x128xi32>
    %6 = arith.cmpi sge, %0, %5 : vector<1x128xi32>
    %7 = arith.extui %6 : vector<1x128xi1> to vector<1x128xi32>
    %8 = arith.sitofp %7 : vector<1x128xi32> to vector<1x128xf32>
    %c2_i32 = arith.constant 2 : i32
    %9 = vector.broadcast %c2_i32 : i32 to vector<1x128xi32>
    %10 = arith.cmpi sge, %0, %9 : vector<1x128xi32>
    %11 = arith.extui %10 : vector<1x128xi1> to vector<1x128xi32>
    %12 = arith.sitofp %11 : vector<1x128xi32> to vector<1x128xf32>
    %c1_i32 = arith.constant 1 : i32
    %13 = vector.broadcast %c1_i32 : i32 to vector<1x128xi32>
    %14 = arith.cmpi sge, %0, %13 : vector<1x128xi32>
    %15 = arith.extui %14 : vector<1x128xi1> to vector<1x128xi32>
    %16 = arith.sitofp %15 : vector<1x128xi32> to vector<1x128xf32>
    %c127_i32 = arith.constant 127 : i32
    %17 = vector.broadcast %c127_i32 : i32 to vector<1x128xi32>
    %18 = arith.cmpi slt, %0, %17 : vector<1x128xi32>
    %19 = arith.extui %18 : vector<1x128xi1> to vector<1x128xi32>
    %20 = arith.sitofp %19 : vector<1x128xi32> to vector<1x128xf32>
    %c126_i32 = arith.constant 126 : i32
    %21 = vector.broadcast %c126_i32 : i32 to vector<1x128xi32>
    %22 = arith.cmpi slt, %0, %21 : vector<1x128xi32>
    %23 = arith.extui %22 : vector<1x128xi1> to vector<1x128xi32>
    %24 = arith.sitofp %23 : vector<1x128xi32> to vector<1x128xf32>
    %c124_i32 = arith.constant 124 : i32
    %25 = vector.broadcast %c124_i32 : i32 to vector<1x128xi32>
    %26 = arith.cmpi slt, %0, %25 : vector<1x128xi32>
    %27 = arith.extui %26 : vector<1x128xi1> to vector<1x128xi32>
    %28 = arith.sitofp %27 : vector<1x128xi32> to vector<1x128xf32>
    %c0 = arith.constant 0 : index
    %c0_0 = arith.constant 0 : index
    %c0_1 = arith.constant 0 : index
    %29 = vector.load %arg1[%c0, %c0_0, %c0_1] : memref<1x8x256xf32, #tpu.memory_space<vmem>>, vector<1x8x256xf32>
    %30 = vector.shape_cast %29 : vector<1x8x256xf32> to vector<8x256xf32>
    %31 = vector.extract_strided_slice %30 {offsets = [0, 0], sizes = [8, 128], strides = [1, 1]} : vector<8x256xf32> to vector<8x128xf32>
    %c255_i32 = arith.constant 255 : i32
    %32 = tpu.dynamic_rotate %30 by %c255_i32 dim 1 : vector<8x256xf32>, i32 -> vector<8x256xf32>
    %33 = vector.extract_strided_slice %32 {offsets = [0, 0], sizes = [8, 128], strides = [1, 1]} : vector<8x256xf32> to vector<8x128xf32>
    %34 = tpu.concatenate %31, %33 in 0 : vector<8x128xf32>, vector<8x128xf32> -> vector<16x128xf32>
    %c0_2 = arith.constant 0 : index
    %c0_3 = arith.constant 0 : index
    %35 = vector.load %arg2[%c0_2, %c0_3] : memref<32x16xf32, #tpu.memory_space<vmem>>, vector<32x16xf32>
    %cst = arith.constant dense<0.000000e+00> : vector<32x128xf32>
    %36 = tpu.matmul %35, %34, %cst {dimension_numbers = #tpu.dot_dimension_numbers<[1], [0], [0], [1], [0, 0, 1, 1], [], []>} : vector<32x16xf32>, vector<16x128xf32>, vector<32x128xf32> -> vector<32x128xf32>
    %37 = vector.extract_strided_slice %36 {offsets = [0, 0], sizes = [16, 128], strides = [1, 1]} : vector<32x128xf32> to vector<16x128xf32>
    %38 = vector.extract_strided_slice %36 {offsets = [16, 0], sizes = [16, 128], strides = [1, 1]} : vector<32x128xf32> to vector<16x128xf32>
    %39 = arith.mulf %37, %37 : vector<16x128xf32>
    %40 = arith.mulf %38, %38 : vector<16x128xf32>
    %41 = arith.addf %39, %40 : vector<16x128xf32>
    %c0_4 = arith.constant 0 : index
    %c0_5 = arith.constant 0 : index
    %42 = vector.load %arg3[%c0_4, %c0_5] : memref<16x16xf32, #tpu.memory_space<vmem>>, vector<16x16xf32>
    %cst_6 = arith.constant dense<0.000000e+00> : vector<16x128xf32>
    %43 = tpu.matmul %42, %41, %cst_6 {dimension_numbers = #tpu.dot_dimension_numbers<[1], [0], [0], [1], [0, 0, 1, 1], [], []>} : vector<16x16xf32>, vector<16x128xf32>, vector<16x128xf32> -> vector<16x128xf32>
    %44 = vector.broadcast %4 : vector<1x128xf32> to vector<16x128xf32>
    %45 = arith.mulf %43, %44 : vector<16x128xf32>
    %46 = arith.mulf %45, %45 : vector<16x128xf32>
    %47 = vector.shape_cast %46 : vector<16x128xf32> to vector<1x16x128xf32>
    %cst_7 = arith.constant dense<0.000000e+00> : vector<1xf32>
    %48 = vector.multi_reduction <add>, %47, %cst_7 [1, 2] : vector<1x16x128xf32> to vector<1xf32>
    %49 = vector.shape_cast %48 : vector<1xf32> to vector<1x1x1xf32>
    %50 = vector.extract %49[0, 0, 0] : f32 from vector<1x1x1xf32>
    %cst_8 = arith.constant 3.125000e-02 : f32
    %51 = arith.mulf %50, %cst_8 : f32
    %52 = math.rsqrt %51 : f32
    %cst_9 = arith.constant 1.000000e+05 : f32
    %53 = arith.minimumf %52, %cst_9 : f32
    %54 = vector.broadcast %53 : f32 to vector<16x128xf32>
    %55 = arith.mulf %45, %54 : vector<16x128xf32>
    %c0_10 = arith.constant 0 : index
    %c0_11 = arith.constant 0 : index
    %56 = vector.load %arg4[%c0_10, %c0_11] : memref<32x48xf32, #tpu.memory_space<vmem>>, vector<32x48xf32>
    %c0_12 = arith.constant 0 : index
    %c0_13 = arith.constant 0 : index
    %57 = vector.load %arg5[%c0_12, %c0_13] : memref<32x1xf32, #tpu.memory_space<vmem>>, vector<32x1xf32>
    %c1_i32_14 = arith.constant 1 : i32
    %58 = tpu.dynamic_rotate %55 by %c1_i32_14 dim 1 : vector<16x128xf32>, i32 -> vector<16x128xf32>
    %59 = vector.broadcast %16 : vector<1x128xf32> to vector<16x128xf32>
    %60 = arith.mulf %58, %59 : vector<16x128xf32>
    %c127_i32_15 = arith.constant 127 : i32
    %61 = tpu.dynamic_rotate %55 by %c127_i32_15 dim 1 : vector<16x128xf32>, i32 -> vector<16x128xf32>
    %62 = vector.broadcast %20 : vector<1x128xf32> to vector<16x128xf32>
    %63 = arith.mulf %61, %62 : vector<16x128xf32>
    %64 = tpu.concatenate %60, %55, %63 in 0 : vector<16x128xf32>, vector<16x128xf32>, vector<16x128xf32> -> vector<48x128xf32>
    %cst_16 = arith.constant dense<0.000000e+00> : vector<32x128xf32>
    %65 = tpu.matmul %56, %64, %cst_16 {dimension_numbers = #tpu.dot_dimension_numbers<[1], [0], [0], [1], [0, 0, 1, 1], [], []>} : vector<32x48xf32>, vector<48x128xf32>, vector<32x128xf32> -> vector<32x128xf32>
    %66 = vector.broadcast %57 : vector<32x1xf32> to vector<32x128xf32>
    %67 = arith.addf %65, %66 : vector<32x128xf32>
    %c0_17 = arith.constant 0 : index
    %68 = memref.load %arg6[%c0_17] : memref<3xf32, #tpu.memory_space<smem>>
    %cst_18 = arith.constant 0.000000e+00 : f32
    %69 = vector.broadcast %cst_18 : f32 to vector<32x128xf32>
    %70 = arith.cmpf oge, %67, %69 : vector<32x128xf32>
    %71 = vector.broadcast %68 : f32 to vector<32x128xf32>
    %72 = arith.mulf %71, %67 : vector<32x128xf32>
    %73 = arith.select %70, %67, %72 : vector<32x128xi1>, vector<32x128xf32>
    %74 = vector.broadcast %4 : vector<1x128xf32> to vector<32x128xf32>
    %75 = arith.mulf %73, %74 : vector<32x128xf32>
    %c0_19 = arith.constant 0 : index
    %c0_20 = arith.constant 0 : index
    %c0_21 = arith.constant 0 : index
    %76 = vector.load %arg7[%c0_19, %c0_20, %c0_21] : memref<3x32x96xf32, #tpu.memory_space<vmem>>, vector<1x32x96xf32>
    %77 = vector.shape_cast %76 : vector<1x32x96xf32> to vector<32x96xf32>
    %c0_22 = arith.constant 0 : index
    %c0_23 = arith.constant 0 : index
    %c0_24 = arith.constant 0 : index
    %78 = vector.load %arg8[%c0_22, %c0_23, %c0_24] : memref<3x32x1xf32, #tpu.memory_space<vmem>>, vector<1x32x1xf32>
    %79 = vector.shape_cast %78 : vector<1x32x1xf32> to vector<32x1xf32>
    %c1_i32_25 = arith.constant 1 : i32
    %80 = tpu.dynamic_rotate %75 by %c1_i32_25 dim 1 : vector<32x128xf32>, i32 -> vector<32x128xf32>
    %81 = vector.broadcast %16 : vector<1x128xf32> to vector<32x128xf32>
    %82 = arith.mulf %80, %81 : vector<32x128xf32>
    %c127_i32_26 = arith.constant 127 : i32
    %83 = tpu.dynamic_rotate %75 by %c127_i32_26 dim 1 : vector<32x128xf32>, i32 -> vector<32x128xf32>
    %84 = vector.broadcast %20 : vector<1x128xf32> to vector<32x128xf32>
    %85 = arith.mulf %83, %84 : vector<32x128xf32>
    %86 = tpu.concatenate %82, %75, %85 in 0 : vector<32x128xf32>, vector<32x128xf32>, vector<32x128xf32> -> vector<96x128xf32>
    %cst_27 = arith.constant dense<0.000000e+00> : vector<32x128xf32>
    %87 = tpu.matmul %77, %86, %cst_27 {dimension_numbers = #tpu.dot_dimension_numbers<[1], [0], [0], [1], [0, 0, 1, 1], [], []>} : vector<32x96xf32>, vector<96x128xf32>, vector<32x128xf32> -> vector<32x128xf32>
    %88 = vector.broadcast %79 : vector<32x1xf32> to vector<32x128xf32>
    %89 = arith.addf %87, %88 : vector<32x128xf32>
    %90 = arith.addf %67, %89 : vector<32x128xf32>
    %c1 = arith.constant 1 : index
    %91 = memref.load %arg6[%c1] : memref<3xf32, #tpu.memory_space<smem>>
    %cst_28 = arith.constant 0.000000e+00 : f32
    %92 = vector.broadcast %cst_28 : f32 to vector<32x128xf32>
    %93 = arith.cmpf oge, %90, %92 : vector<32x128xf32>
    %94 = vector.broadcast %91 : f32 to vector<32x128xf32>
    %95 = arith.mulf %94, %90 : vector<32x128xf32>
    %96 = arith.select %93, %90, %95 : vector<32x128xi1>, vector<32x128xf32>
    %97 = vector.broadcast %4 : vector<1x128xf32> to vector<32x128xf32>
    %98 = arith.mulf %96, %97 : vector<32x128xf32>
    %c1_29 = arith.constant 1 : index
    %c0_30 = arith.constant 0 : index
    %c0_31 = arith.constant 0 : index
    %99 = vector.load %arg7[%c1_29, %c0_30, %c0_31] : memref<3x32x96xf32, #tpu.memory_space<vmem>>, vector<1x32x96xf32>
    %100 = vector.shape_cast %99 : vector<1x32x96xf32> to vector<32x96xf32>
    %c1_32 = arith.constant 1 : index
    %c0_33 = arith.constant 0 : index
    %c0_34 = arith.constant 0 : index
    %101 = vector.load %arg8[%c1_32, %c0_33, %c0_34] : memref<3x32x1xf32, #tpu.memory_space<vmem>>, vector<1x32x1xf32>
    %102 = vector.shape_cast %101 : vector<1x32x1xf32> to vector<32x1xf32>
    %c2_i32_35 = arith.constant 2 : i32
    %103 = tpu.dynamic_rotate %98 by %c2_i32_35 dim 1 : vector<32x128xf32>, i32 -> vector<32x128xf32>
    %104 = vector.broadcast %12 : vector<1x128xf32> to vector<32x128xf32>
    %105 = arith.mulf %103, %104 : vector<32x128xf32>
    %c126_i32_36 = arith.constant 126 : i32
    %106 = tpu.dynamic_rotate %98 by %c126_i32_36 dim 1 : vector<32x128xf32>, i32 -> vector<32x128xf32>
    %107 = vector.broadcast %24 : vector<1x128xf32> to vector<32x128xf32>
    %108 = arith.mulf %106, %107 : vector<32x128xf32>
    %109 = tpu.concatenate %105, %98, %108 in 0 : vector<32x128xf32>, vector<32x128xf32>, vector<32x128xf32> -> vector<96x128xf32>
    %cst_37 = arith.constant dense<0.000000e+00> : vector<32x128xf32>
    %110 = tpu.matmul %100, %109, %cst_37 {dimension_numbers = #tpu.dot_dimension_numbers<[1], [0], [0], [1], [0, 0, 1, 1], [], []>} : vector<32x96xf32>, vector<96x128xf32>, vector<32x128xf32> -> vector<32x128xf32>
    %111 = vector.broadcast %102 : vector<32x1xf32> to vector<32x128xf32>
    %112 = arith.addf %110, %111 : vector<32x128xf32>
    %113 = arith.addf %90, %112 : vector<32x128xf32>
    %c2 = arith.constant 2 : index
    %114 = memref.load %arg6[%c2] : memref<3xf32, #tpu.memory_space<smem>>
    %cst_38 = arith.constant 0.000000e+00 : f32
    %115 = vector.broadcast %cst_38 : f32 to vector<32x128xf32>
    %116 = arith.cmpf oge, %113, %115 : vector<32x128xf32>
    %117 = vector.broadcast %114 : f32 to vector<32x128xf32>
    %118 = arith.mulf %117, %113 : vector<32x128xf32>
    %119 = arith.select %116, %113, %118 : vector<32x128xi1>, vector<32x128xf32>
    %120 = vector.broadcast %4 : vector<1x128xf32> to vector<32x128xf32>
    %121 = arith.mulf %119, %120 : vector<32x128xf32>
    %c2_39 = arith.constant 2 : index
    %c0_40 = arith.constant 0 : index
    %c0_41 = arith.constant 0 : index
    %122 = vector.load %arg7[%c2_39, %c0_40, %c0_41] : memref<3x32x96xf32, #tpu.memory_space<vmem>>, vector<1x32x96xf32>
    %123 = vector.shape_cast %122 : vector<1x32x96xf32> to vector<32x96xf32>
    %c2_42 = arith.constant 2 : index
    %c0_43 = arith.constant 0 : index
    %c0_44 = arith.constant 0 : index
    %124 = vector.load %arg8[%c2_42, %c0_43, %c0_44] : memref<3x32x1xf32, #tpu.memory_space<vmem>>, vector<1x32x1xf32>
    %125 = vector.shape_cast %124 : vector<1x32x1xf32> to vector<32x1xf32>
    %c4_i32_45 = arith.constant 4 : i32
    %126 = tpu.dynamic_rotate %121 by %c4_i32_45 dim 1 : vector<32x128xf32>, i32 -> vector<32x128xf32>
    %127 = vector.broadcast %8 : vector<1x128xf32> to vector<32x128xf32>
    %128 = arith.mulf %126, %127 : vector<32x128xf32>
    %c124_i32_46 = arith.constant 124 : i32
    %129 = tpu.dynamic_rotate %121 by %c124_i32_46 dim 1 : vector<32x128xf32>, i32 -> vector<32x128xf32>
    %130 = vector.broadcast %28 : vector<1x128xf32> to vector<32x128xf32>
    %131 = arith.mulf %129, %130 : vector<32x128xf32>
    %132 = tpu.concatenate %128, %121, %131 in 0 : vector<32x128xf32>, vector<32x128xf32>, vector<32x128xf32> -> vector<96x128xf32>
    %cst_47 = arith.constant dense<0.000000e+00> : vector<32x128xf32>
    %133 = tpu.matmul %123, %132, %cst_47 {dimension_numbers = #tpu.dot_dimension_numbers<[1], [0], [0], [1], [0, 0, 1, 1], [], []>} : vector<32x96xf32>, vector<96x128xf32>, vector<32x128xf32> -> vector<32x128xf32>
    %134 = vector.broadcast %125 : vector<32x1xf32> to vector<32x128xf32>
    %135 = arith.addf %133, %134 : vector<32x128xf32>
    %136 = arith.addf %113, %135 : vector<32x128xf32>
    %137 = vector.extract_strided_slice %136 {offsets = [0, 0], sizes = [32, 32], strides = [1, 1]} : vector<32x128xf32> to vector<32x32xf32>
    %c0_48 = arith.constant 0 : index
    %c0_49 = arith.constant 0 : index
    %c0_50 = arith.constant 0 : index
    %138 = vector.load %arg9[%c0_48, %c0_49, %c0_50] : memref<1x32x32xf32, #tpu.memory_space<vmem>>, vector<1x32x32xf32>
    %139 = vector.shape_cast %138 : vector<1x32x32xf32> to vector<32x32xf32>
    %140 = vector.shape_cast %137 : vector<32x32xf32> to vector<1x32x32xf32>
    tpu.vector_store %arg9[%c0_48, %c0_49, %c0_50], %140 {strides = array<i32>} : memref<1x32x32xf32, #tpu.memory_space<vmem>>, vector<1x32x32xf32>,
    return
  }
  func.func @transform_0(%arg0: i32) -> (i32, i32, i32) {
    %c0_i32 = arith.constant 0 : i32
    %c0_i32_0 = arith.constant 0 : i32
    %c0_i32_1 = arith.constant 0 : i32
    return %arg0, %c0_i32, %c0_i32_0 : i32, i32, i32
  }
  func.func @transform_1(%arg0: i32) -> (i32, i32) {
    %c0_i32 = arith.constant 0 : i32
    %c0_i32_0 = arith.constant 0 : i32
    %c0_i32_1 = arith.constant 0 : i32
    return %c0_i32, %c0_i32_0 : i32, i32
  }
  func.func @transform_2(%arg0: i32) -> (i32, i32) {
    %c0_i32 = arith.constant 0 : i32
    %c0_i32_0 = arith.constant 0 : i32
    %c0_i32_1 = arith.constant 0 : i32
    return %c0_i32, %c0_i32_0 : i32, i32
  }
  func.func @transform_3(%arg0: i32) -> (i32, i32) {
    %c0_i32 = arith.constant 0 : i32
    %c0_i32_0 = arith.constant 0 : i32
    %c0_i32_1 = arith.constant 0 : i32
    return %c0_i32, %c0_i32_0 : i32, i32
  }
  func.func @transform_4(%arg0: i32) -> (i32, i32) {
    %c0_i32 = arith.constant 0 : i32
    %c0_i32_0 = arith.constant 0 : i32
    %c0_i32_1 = arith.constant 0 : i32
    return %c0_i32, %c0_i32_0 : i32, i32
  }
  func.func @transform_5(%arg0: i32) -> i32 {
    %c0_i32 = arith.constant 0 : i32
    %c0_i32_0 = arith.constant 0 : i32
    return %c0_i32 : i32
  }
  func.func @transform_6(%arg0: i32) -> (i32, i32, i32) {
    %c0_i32 = arith.constant 0 : i32
    %c0_i32_0 = arith.constant 0 : i32
    %c0_i32_1 = arith.constant 0 : i32
    %c0_i32_2 = arith.constant 0 : i32
    return %c0_i32, %c0_i32_0, %c0_i32_1 : i32, i32, i32
  }
  func.func @transform_7(%arg0: i32) -> (i32, i32, i32) {
    %c0_i32 = arith.constant 0 : i32
    %c0_i32_0 = arith.constant 0 : i32
    %c0_i32_1 = arith.constant 0 : i32
    %c0_i32_2 = arith.constant 0 : i32
    return %c0_i32, %c0_i32_0, %c0_i32_1 : i32, i32, i32
  }
  func.func @transform_8(%arg0: i32) -> (i32, i32, i32) {
    %c0_i32 = arith.constant 0 : i32
    %c0_i32_0 = arith.constant 0 : i32
    %c0_i32_1 = arith.constant 0 : i32
    return %arg0, %c0_i32, %c0_i32_0 : i32, i32, i32
  }
}

</mosaic_0001>

<bundles_post_ra>
// kernel: tpu_custom_call.1
= control target key start
LH: loop header
LB: loop body
LE: loop exit
PB: predicated region body
PF: predicated region fallthrough
CT: control target
= control target key end

     0   :  { %13 = vsyncpa [#allocation4], 0  ;;  %s2271_s0 = inlined_call_operand.vmem [shape: f32[2,8,256], index: 0, kind: input, shape index: {}]   ;;  %s2272_s1 = inlined_call_operand.vmem [shape: f32[32,16], index: 1, kind: input, shape index: {}]   ;;  %s2273_s2 = inlined_call_operand.vmem [shape: f32[16,16], index: 2, kind: input, shape index: {}]   ;;  %s2274_s3 = inlined_call_operand.vmem [shape: f32[32,48], index: 3, kind: input, shape index: {}]   ;;  %s2275_s4 = inlined_call_operand.vmem [shape: f32[32,1], index: 4, kind: input, shape index: {}]   ;;  %s2276_s5 = inlined_call_operand.vmem [shape: f32[3], index: 5, kind: input, shape index: {}]   ;;  %s2277_s6 = inlined_call_operand.vmem [shape: f32[3,32,96], index: 6, kind: input, shape index: {}]   ;;  %s2278_s7 = inlined_call_operand.vmem [shape: f32[3,32,1], index: 7, kind: input, shape index: {}]   ;;  %s2279_s8 = inlined_call_operand.hbm [shape: f32[2,32,32], index: 8, kind: output, shape index: {}]  }
   0x1   :  { %14 = vsyncpa [#allocation3], 0 }
   0x2   :  { %16 = vsyncpa [#allocation3 + $0x1], 0  ;;  %s1873_s27 = smov 0   ;;  %s1875_s28 = smov 0  }
   0x3   :  { %s1877_s29 = smov 0   ;;  %s1879_s30 = smov 0  }
   0x4 LB: > { %s1894_s9 = sadd.s32 4294967295, %s1813_s30   ;;  %s1310_s10 = sadd.s32 4294967294, %s1813_s30   ;;  %s1813_s30 = sphi %s1879_s30, %s2286_s30   ;;  %s1809_s29 = sphi %s1877_s29, %s2285_s29   ;;  %s1805_s28 = sphi %s1875_s28, %s2284_s28   ;;  %s1801_s27 = sphi %s1873_s27, %s2283_s27  }
   0x5   : > { %s1898_s11 = sadd.s32 1, %s1813_s30   ;;  %s202_s12 = sadd.s32 1, %s1809_s29 }
   0x6   : > { %s199_s13 = ssub.s32 %s1813_s30, %s1898_s11  ;;  %p212_p0 = scmp.ne.s32.totalorder %s1809_s29, %s1805_s28 }
   0x7   : > { %p200_p1 = scmp.eq.s32.totalorder %s199_s13, 0  ;;  %p213_p2 = scmp.eq.s32.totalorder %s1894_s9, 1 }
   0x8   : > { %p218_p3 = scmp.ne.s32.totalorder %s1805_s28, %s1801_s27  ;;  %p219_p4 = scmp.eq.s32.totalorder %s1310_s10, 1 }
   0x9   : > { %s1909_s14 = scalar_select %p200_p1, %s1809_s29, %s202_s12  }
   0xa   : > { %p1911_p5 = por %p213_p2, %p212_p0  ;;  %p1915_p6 = por %p219_p4, %p218_p3 }
   0xb   : > { %p1311_p7 = scmp.ge.s32.totalorder %s1813_s30, 1  ;;  %p226_p8 = scmp.lt.s32.totalorder %s1813_s30, 3 }
   0xc   : > { %p1676_p9 = scmp.eq.s32.totalorder %s1894_s9, 0  ;;  %s251_s20 = sshll.u32 %s2276_s5, 4  ;;  %s252_s20 = int_to_ptr.vmem [resolvable:$true] %s251_s20 }
   0xd   : > { %p1922_p10 = pnand %p1311_p7, %p226_p8  ;;  %s1732_s21 = scalar_lea.vmem %s252_s20, 16 }
   0xe   : > { %p1733_p13 = scmp.ne.s32.totalorder %s252_s20, %s1732_s21  ;;  %p1740_p3 = scmp.lt.s32.totalorder %s252_s20, %s252_s20 }
   0xf   : > { %p1668_p11 = pneg %p1922_p10  ;;  %p1741_p4 = scmp.lt.s32.totalorder %s1732_s21, %s1732_s21 }
  0x11   : > { %p1669_p12 = pnand %p1676_p9, %p1668_p11  ;;  %p1742_p7 = por %p1741_p4, %p1740_p3 }
  0x13   : > { %p1734_p0 = pneg %p1669_p12 }
  0x15   : > { %p1735_p1 = pnand %p1734_p0, %p1733_p13 }
  0x17   : > { %p1736_p2 = pneg %p1735_p1 }
  0x19   : > { %p1743_p8 = pnand %p1742_p7, %p1736_p2 }
  0x1b   : > { %1746 = shalt.err (!%p1743_p8)
}
  0x1c   : > { %s1815_s22 = smov [#allocation2]   ;;  %278 = sbr.rel (%p1922_p10) target bundleno = 2357 (0x935), region = 52 }
  0x1d   : > { %1671 = dma.vmem_to_smem (!%p1669_p12), %s252_s20, 16, %s1815_s22, [#allocation4]  }
  0x23   : > { %1792 = dma.done.wait (%p1676_p9), [#allocation4], 16  }
  0x24   : > { %1794 = vsyncadd (%p1676_p9), [#allocation4], 4294967280 }
  0x25   : > { %284 = sfence }
  0x26   : > { %p313_p11 = scmp.lt.s32.totalorder %s1894_s9, 1  ;;  %v348_v0 = vld [vmem:[%s2272_s1] sm:$0xff]  ;;  %vm352_vm0 = vcmask 130048   ;;  %s1816_s17 = smov 127   ;;  %v318_v4 = vlaneseq  ;;  %v349_v11 = vld [vmem:[%s2272_s1 + $0x8] sm:$0xff]  ;;  %v350_v12 = vld [vmem:[%s2272_s1 + $0x10] sm:$0xff] }
  0x27   : > { %1445 = vmatprep.mubr.msk.f32.mxu0 %vm352_vm0, %v348_v0  ;;  %v351_v13 = vld [vmem:[%s2272_s1 + $0x18] sm:$0xff]  ;;  %v456_v14 = vld [vmem:[%s2273_s2] sm:$0xff]  ;;  %v457_v26 = vld [vmem:[%s2273_s2 + $0x8] sm:$0xff]  ;;  %v1817_v27 = vmov 0.0   ;;  %s1818_s19 = smov 100000.0   ;;  %s1819_s21 = smov 1  }
  0x28   : > { %s314_s23 = scalar_select %p313_p11, %s1894_s9, 1  ;;  %v1949_v5 = vand.u32 127, %v318_v4  ;;  %v561_v49 = vld [vmem:[%s2274_s3] sm:$0xff]  ;;  %vm601_vm3 = vcmask 392192   ;;  %v1820_v50 = vmov 0   ;;  %v566_v52 = vld [vmem:[%s2275_s4 + $0x8] sm:$0xff] }
  0x29   : > { %1729 = vset.pattern.permute.xlu0 %v1820_v50  ;;  %1728 = vset.pattern.permute.xlu1 %v1820_v50  ;;  %v565_v51 = vld [vmem:[%s2275_s4] sm:$0xff]  ;;  %v567_v53 = vld [vmem:[%s2275_s4 + $0x10] sm:$0xff]  ;;  %v568_v54 = vld [vmem:[%s2275_s4 + $0x18] sm:$0xff]  ;;  %s699_s10 = sld [smem:[#allocation2]]  ;;  %vm769_vm9 = vcmask 785408   ;;  %s1353_s25 = sld [smem:[#allocation2 + $0x2]] }
  0x2a   : > { %s1371_s26 = sshll.u32 %s314_s23, 4  ;;  %vm332_vm1 = vcmp.lt.s32.totalorder %v1949_v5, 127  ;;  %vm320_vm2 = vcmp.lt.s32.totalorder %v1949_v5, 32  ;;  %vm329_vm4 = vcmp.ge.s32.totalorder %v1949_v5, 1  ;;  %v563_v4 = vld [vmem:[%s2274_s3 + $0x10] sm:$0xff]  ;;  %vm326_vm14 = vcmp.ge.s32.totalorder %v1949_v5, 2 }
  0x2b   : > { %s317_s13 = scalar_lea.vmem %s2271_s0, %s1371_s26  ;;  %v1976_v28 = vsel %vm320_vm2, 1.0, %v1817_v27  ;;  %v2002_v56 = vsel %vm329_vm4, 1.0, %v1817_v27  ;;  %v2009_v62 = vsel %vm332_vm1, 1.0, %v1817_v27  ;;  %vm335_vm15 = vcmp.lt.s32.totalorder %v1949_v5, 126  ;;  %s1824_s26 = smov 124  }
  0x2c   : > { %v341_v1 = vld [vmem:[%s317_s13] sm:$0xff]  ;;  %v342_v2 = vld [vmem:[%s317_s13 + $0x8] sm:$0xff]  ;;  %vm323_vm4 = vcmp.ge.s32.totalorder %v1949_v5, 4  ;;  %s1372_s22 = sshll.u32 %s1894_s9, 9 }
  0x2d   : > { %v1723_v3 = vpack.i.bf16 %v342_v2, %v341_v1 }
  0x2f   : > { %1724 = vrot.lane.b32.xlu0 %v1723_v3, %s1816_s17  ;;  %v562_v3 = vld [vmem:[%s2274_s3 + $0x8] sm:$0xff] }
  0xa1   : > { %v1725_v6 = vpop.permute.xlu0 %1724 }
  0xa2   : > { %v1727_v7 = vunpack.i.h.bf16 %v1725_v6  ;;  %v1726_v8 = vunpack.i.l.bf16 %v1725_v6  ;;  %v564_v6 = vld [vmem:[%s2274_s3 + $0x18] sm:$0xff] }
  0xa4   : > { %v347_v9 = vsel %vm332_vm1, %v1726_v8, %v1727_v7 }
  0xa5   : > { %v1566_v10 = vpack.c.bf16 %v347_v9, %v341_v1 }
  0xa7   : > { %1567 = vmatprep.subr.bf16.mxu0 %v1566_v10 }
  0xa8   : > { %1569 = vmatpush3.bf16.msra.mxu0 %v1566_v10 }
  0xab   : > { %1446 = vmatmul.mubr.msk.f32.vlgmr.msra.gmra.mrb[0].mxu0 %vm352_vm0, %v349_v11  ;;  %v704_v11 = vstv %s699_s10 }
  0xac   : > { %1448 = vmatprep.mubr.msk.f32.mxu0 %vm352_vm0, %v350_v12 }
  0xaf   : > { %1449 = vmatmul.mubr.msk.f32.gmra.mrb[2].mxu0 %vm352_vm0, %v351_v13 }
  0xb0   : > { %1455 = vmatprep.mubr.msk.f32.mxu0 %vm352_vm0, %v456_v14 }
 0x17e   : > { %v1447_v15 = vpop.f32.mrb[0].mxu0 }
 0x17f   : > { %v431_v16 = vpop.f32.mrb[1].mxu0  ;;  %v451_v18 = vmul.f32 %v1447_v15, %v1447_v15 }
 0x180   : > { %v450_v21 = vmul.f32 %v431_v16, %v431_v16 }
 0x182   : > { %v1450_v17 = vpop.f32.mrb[2].mxu0 }
 0x183   : > { %v453_v19 = vmul.f32 %v1450_v17, %v1450_v17  ;;  %v441_v20 = vpop.f32.mrb[3].mxu0 }
 0x184   : > { %v452_v22 = vmul.f32 %v441_v20, %v441_v20 }
 0x185   : > { %v455_v23 = vadd.f32 %v453_v19, %v451_v18 }
 0x186   : > { %v454_v24 = vadd.f32 %v452_v22, %v450_v21 }
 0x188   : > { %v1570_v25 = vpack.c.bf16 %v455_v23, %v454_v24 }
 0x18a   : > { %1571 = vmatprep.subr.bf16.mxu0 %v1570_v25 }
 0x18b   : > { %1573 = vmatpush3.bf16.msra.mxu0 %v1570_v25 }
 0x18e   : > { %1456 = vmatmul.mubr.msk.f32.vlgmr.msra.gmra.mrb[4].mxu0 %vm352_vm0, %v457_v26 }
 0x18f   : > { %1470 = vmatprep.mubr.msk.f32.mxu0 %vm601_vm3, %v561_v49 }
 0x261   : > { %v1457_v29 = vpop.f32.mrb[4].mxu0 }
 0x262   : > { %v540_v30 = vmul.f32 %v1457_v29, %v1976_v28  ;;  %v530_v31 = vpop.f32.mrb[5].mxu0 }
 0x263   : > { %v539_v32 = vmul.f32 %v1976_v28, %v530_v31 }
 0x264   : > { %v542_v33 = vmul.f32 %v540_v30, %v540_v30 }
 0x265   : > { %v541_v34 = vmul.f32 %v539_v32, %v539_v32 }
 0x267   : > { %v543_v35 = vadd.f32 %v542_v33, %v541_v34 }
 0x269   : > { %544 = vadd.xlane.f32.xlu0 %v543_v35 }
 0x2f6   : > { %v545_v36 = vpop.xlane.xlu0 %544 }
 0x2f7   : > { %v546_v37 = vrot.slane %v545_v36, 4 }
 0x2f9   : > { %v547_v38 = vadd.f32 %v546_v37, %v545_v36  ;;  %v717_v36 = vld [vmem:[%s2277_s6] sm:$0xff]  ;;  %v722_v37 = vld [vmem:[%s2278_s7 + $0x8] sm:$0xff] }
 0x2fa   : > { %1500 = vmatprep.mubr.msk.f32.mxu1 %vm769_vm9, %v717_v36  ;;  %v1345_v36 = vld [vmem:[%s2278_s7 + $0x20] sm:$0xff] }
 0x2fb   : > { %v548_v39 = vrot.slane %v547_v38, 2 }
 0x2fd   : > { %v549_v40 = vadd.f32 %v548_v39, %v547_v38  ;;  %v723_v38 = vld [vmem:[%s2278_s7 + $0x10] sm:$0xff]  ;;  %v721_v39 = vld [vmem:[%s2278_s7] sm:$0xff] }
 0x2ff   : > { %v550_v41 = vrot.slane %v549_v40, 1 }
 0x301   : > { %v551_v42 = vadd.f32 %v550_v41, %v549_v40  ;;  %v724_v40 = vld [vmem:[%s2278_s7 + $0x18] sm:$0xff] }
 0x303   : > { %1658 = vpush %v551_v42 }
 0x334   : > { %s1659_s12 = spop %1658 }
 0x335   : > { %s553_s13 = smul.f32 0.03125, %s1659_s12 }
 0x337   : > { %v554_v43 = vstv %s553_s13 }
 0x338   : > { %1730 = vrsqrt.f32 %v554_v43 }
 0x342   : > { %v1731_v44 = vpop.eup %1730 }
 0x343   : > { %1660 = vpush %v1731_v44 }
 0x374   : > { %s1661_s18 = spop %1660 }
 0x375   : > { %s557_s20 = smin.f32 %s1818_s19, %s1661_s18  ;;  %s1340_s19 = sld [smem:[#allocation2 + $0x1]] }
 0x376   : > { %v558_v45 = vstv %s557_s20  ;;  %s1822_s20 = smov 126   ;;  %s310_s18 = sand.u32 1, %s1805_s28  }
 0x377   : > { %v559_v46 = vmul.f32 %v558_v45, %v539_v32  ;;  %v560_v47 = vmul.f32 %v558_v45, %v540_v30  ;;  %s2230_s9 = scalar_lea.sflag [#allocation3], %s310_s18 }
 0x379   : > { %569 = vrot.lane.b32.xlu1 %v559_v46, %s1819_s21  ;;  %v1578_v48 = vpack.c.bf16 %v560_v47, %v559_v46 }
 0x37d   : > { %571 = vrot.lane.b32.xlu1 %v560_v47, %s1819_s21 }
 0x381   : > { %575 = vrot.lane.b32.xlu1 %v559_v46, %s1816_s17 }
 0x385   : > { %577 = vrot.lane.b32.xlu1 %v560_v47, %s1816_s17 }
 0x389   : > { %583 = vperm.xlu1 %1728, %v565_v51  }
 0x38d   : > { %588 = vperm.xlu1 %1728, %v566_v52  }
 0x391   : > { %593 = vperm.xlu1 %1728, %v567_v53  }
 0x395   : > { %598 = vperm.xlu1 %1728, %v568_v54  }
 0x3eb   : > { %v570_v55 = vpop.permute.xlu1 %569 }
 0x3ec   : > { %v573_v58 = vmul.f32 %v2002_v56, %v570_v55 }
 0x3ef   : > { %v572_v57 = vpop.permute.xlu1 %571 }
 0x3f0   : > { %v574_v59 = vmul.f32 %v2002_v56, %v572_v57 }
 0x3f2   : > { %v1574_v60 = vpack.c.bf16 %v574_v59, %v573_v58 }
 0x3f3   : > { %v576_v61 = vpop.permute.xlu1 %575 }
 0x3f4   : > { %1575 = vmatprep.subr.bf16.mxu0 %v1574_v60  ;;  %v579_v0 = vmul.f32 %v2009_v62, %v576_v61  ;;  %v718_v61 = vld [vmem:[%s2277_s6 + $0x8] sm:$0xff] }
 0x3f5   : > { %1577 = vmatpush3.bf16.msra.mxu0 %v1574_v60 }
 0x3f6   : > { %1579 = vmatprep.subr.bf16.mxu0 %v1578_v48 }
 0x3f7   : > { %v578_v63 = vpop.permute.xlu1 %577 }
 0x3f8   : > { %v580_v1 = vmul.f32 %v2009_v62, %v578_v63  ;;  %v719_v63 = vld [vmem:[%s2277_s6 + $0x10] sm:$0xff] }
 0x3f9   : > { %1581 = vmatpush3.bf16.msra.mxu0 %v1578_v48 }
 0x3fa   : > { %v1582_v2 = vpack.c.bf16 %v580_v1, %v579_v0 }
 0x3fc   : > { %1583 = vmatprep.subr.bf16.mxu0 %v1582_v2 }
 0x3fd   : > { %1585 = vmatpush3.bf16.msra.mxu0 %v1582_v2 }
 0x400   : > { %1471 = vmatmul.mubr.msk.f32.vlgmr.msra.gmra.mrb[6].mxu0 %vm601_vm3, %v562_v3 }
 0x401   : > { %1473 = vmatprep.mubr.msk.f32.mxu0 %vm601_vm3, %v563_v4 }
 0x404   : > { %1474 = vmatmul.mubr.msk.f32.gmra.mrb[8].mxu0 %vm601_vm3, %v564_v6 }
 0x408   : > { %v584_v7 = vpop.permute.xlu1 %583 }
 0x40c   : > { %v589_v8 = vpop.permute.xlu1 %588 }
 0x410   : > { %v594_v9 = vpop.permute.xlu1 %593 }
 0x414   : > { %v599_v16 = vpop.permute.xlu1 %598 }
 0x4d3   : > { %v1472_v10 = vpop.f32.mrb[6].mxu0 }
 0x4d4   : > { %v2025_v12 = vadd.f32 %v1472_v10, %v589_v8  ;;  %v680_v13 = vpop.f32.mrb[7].mxu0 }
 0x4d5   : > { %v2027_v14 = vadd.f32 %v680_v13, %v584_v7  ;;  %v876_v7 = vstv %s1340_s19  ;;  %s1316_s19 = sshll.u32 %s310_s18, 5 }
 0x4d6   : > { %v706_v15 = vmul.f32 %v704_v11, %v2025_v12  ;;  %vm701_vm5 = vcmp.ge.f32.partialorder %v2025_v12, 0.0 }
 0x4d7   : > { %v705_v17 = vmul.f32 %v704_v11, %v2027_v14  ;;  %v1475_v18 = vpop.f32.mrb[8].mxu0  ;;  %vm700_vm6 = vcmp.ge.f32.partialorder %v2027_v14, 0.0 }
 0x4d8   : > { %v2033_v19 = vadd.f32 %v1475_v18, %v599_v16  ;;  %v690_v20 = vpop.f32.mrb[9].mxu0  ;;  %v710_v21 = vsel %vm701_vm5, %v2025_v12, %v706_v15  ;;  %vm338_vm5 = vcmp.lt.s32.totalorder %v1949_v5, 124 }
 0x4d9   : > { %v2036_v22 = vadd.f32 %v690_v20, %v594_v9  ;;  %v714_v23 = vmul.f32 %v1976_v28, %v710_v21  ;;  %v709_v24 = vsel %vm700_vm6, %v2027_v14, %v705_v17  ;;  %vm1217_vm6 = vcmask 261120  }
 0x4da   : > { %v708_v25 = vmul.f32 %v704_v11, %v2033_v19  ;;  %v713_v26 = vmul.f32 %v1976_v28, %v709_v24  ;;  %vm703_vm7 = vcmp.ge.f32.partialorder %v2033_v19, 0.0 }
 0x4db   : > { %v707_v29 = vmul.f32 %v704_v11, %v2036_v22  ;;  %727 = vrot.lane.b32.xlu0 %v714_v23, %s1819_s21  ;;  %vm702_vm8 = vcmp.ge.f32.partialorder %v2036_v22, 0.0 }
 0x4dc   : > { %725 = vrot.lane.b32.xlu1 %v713_v26, %s1819_s21  ;;  %v712_v30 = vsel %vm703_vm7, %v2033_v19, %v708_v25  ;;  %v1594_v31 = vpack.c.bf16 %v714_v23, %v713_v26 }
 0x4dd   : > { %v716_v32 = vmul.f32 %v1976_v28, %v712_v30  ;;  %v711_v33 = vsel %vm702_vm8, %v2036_v22, %v707_v29 }
 0x4de   : > { %v715_v34 = vmul.f32 %v1976_v28, %v711_v33 }
 0x4df   : > { %751 = vperm.xlu0 %1729, %v721_v39   ;;  %v1321_v39 = vsel %vm326_vm14, 1.0, %v1817_v27 }
 0x4e0   : > { %731 = vrot.lane.b32.xlu1 %v716_v32, %s1819_s21  ;;  %v1598_v35 = vpack.c.bf16 %v716_v32, %v715_v34 }
 0x4e3   : > { %766 = vperm.xlu0 %1729, %v724_v40  }
 0x4e4   : > { %729 = vrot.lane.b32.xlu1 %v715_v34, %s1819_s21  ;;  %s1821_s21 = smov 2  }
 0x4e8   : > { %737 = vrot.lane.b32.xlu1 %v713_v26, %s1816_s17 }
 0x4ec   : > { %739 = vrot.lane.b32.xlu1 %v714_v23, %s1816_s17 }
 0x4f0   : > { %741 = vrot.lane.b32.xlu1 %v715_v34, %s1816_s17  ;;  %v1346_v34 = vld [vmem:[%s2278_s7 + $0x28] sm:$0xff] }
 0x4f4   : > { %743 = vrot.lane.b32.xlu1 %v716_v32, %s1816_s17  ;;  %s1823_s17 = smov 4  }
 0x4f8   : > { %756 = vperm.xlu1 %1728, %v722_v37   ;;  %v1348_v37 = vld [vmem:[%s2278_s7 + $0x38] sm:$0xff] }
 0x4fc   : > { %761 = vperm.xlu1 %1728, %v723_v38   ;;  %v1347_v38 = vld [vmem:[%s2278_s7 + $0x30] sm:$0xff] }
 0x54d   : > { %v728_v41 = vpop.permute.xlu0 %727 }
 0x54e   : > { %v734_v42 = vmul.f32 %v2002_v56, %v728_v41  ;;  %v726_v43 = vpop.permute.xlu1 %725 }
 0x54f   : > { %v733_v44 = vmul.f32 %v2002_v56, %v726_v43 }
 0x551   : > { %v1586_v45 = vpack.c.bf16 %v734_v42, %v733_v44 }
 0x552   : > { %v732_v46 = vpop.permute.xlu1 %731 }
 0x553   : > { %1587 = vmatprep.subr.bf16.mxu1 %v1586_v45  ;;  %v736_v48 = vmul.f32 %v2002_v56, %v732_v46 }
 0x554   : > { %1589 = vmatpush3.bf16.msra.mxu1 %v1586_v45 }
 0x556   : > { %v730_v47 = vpop.permute.xlu1 %729 }
 0x557   : > { %v735_v49 = vmul.f32 %v2002_v56, %v730_v47 }
 0x559   : > { %v1590_v50 = vpack.c.bf16 %v736_v48, %v735_v49 }
 0x55a   : > { %v738_v51 = vpop.permute.xlu1 %737 }
 0x55b   : > { %1591 = vmatprep.subr.bf16.mxu1 %v1590_v50  ;;  %v745_v54 = vmul.f32 %v2009_v62, %v738_v51 }
 0x55c   : > { %1593 = vmatpush3.bf16.msra.mxu1 %v1590_v50 }
 0x55d   : > { %1595 = vmatprep.subr.bf16.mxu1 %v1594_v31 }
 0x55e   : > { %v740_v52 = vpop.permute.xlu1 %739  ;;  %v752_v0 = vpop.permute.xlu0 %751 }
 0x55f   : > { %v746_v53 = vmul.f32 %v2009_v62, %v740_v52  ;;  %v1324_v52 = vsel %vm335_vm15, 1.0, %v1817_v27 }
 0x560   : > { %1597 = vmatpush3.bf16.msra.mxu1 %v1594_v31 }
 0x561   : > { %1599 = vmatprep.subr.bf16.mxu1 %v1598_v35  ;;  %v1602_v57 = vpack.c.bf16 %v746_v53, %v745_v54 }
 0x562   : > { %v742_v55 = vpop.permute.xlu1 %741  ;;  %v767_v10 = vpop.permute.xlu0 %766 }
 0x563   : > { %v747_v59 = vmul.f32 %v2009_v62, %v742_v55 }
 0x564   : > { %1601 = vmatpush3.bf16.msra.mxu1 %v1598_v35  ;;  %v1341_v35 = vld [vmem:[%s2277_s6 + $0x20] sm:$0xff] }
 0x565   : > { %1603 = vmatprep.subr.bf16.mxu1 %v1602_v57  ;;  %1530 = vmatprep.mubr.msk.f32.mxu0 %vm769_vm9, %v1341_v35  ;;  %v1354_v35 = vld [vmem:[%s2277_s6 + $0x40] sm:$0xff] }
 0x566   : > { %v744_v58 = vpop.permute.xlu1 %743 }
 0x567   : > { %v748_v56 = vmul.f32 %v2009_v62, %v744_v58  ;;  %v720_v62 = vld [vmem:[%s2277_s6 + $0x18] sm:$0xff] }
 0x568   : > { %1605 = vmatpush3.bf16.msra.mxu1 %v1602_v57 }
 0x569   : > { %v1606_v60 = vpack.c.bf16 %v748_v56, %v747_v59 }
 0x56b   : > { %1607 = vmatprep.subr.bf16.mxu1 %v1606_v60 }
 0x56c   : > { %1609 = vmatpush3.bf16.msra.mxu1 %v1606_v60 }
 0x56f   : > { %1501 = vmatmul.mubr.msk.f32.vlgmr.msra.gmra.mrb[0].mxu1 %vm769_vm9, %v718_v61  ;;  %v1342_v61 = vld [vmem:[%s2277_s6 + $0x28] sm:$0xff] }
 0x570   : > { %1503 = vmatprep.mubr.msk.f32.mxu1 %vm769_vm9, %v719_v63  ;;  %v1343_v63 = vld [vmem:[%s2277_s6 + $0x30] sm:$0xff] }
 0x573   : > { %1504 = vmatmul.mubr.msk.f32.gmra.mrb[2].mxu1 %vm769_vm9, %v720_v62  ;;  %v1344_v62 = vld [vmem:[%s2277_s6 + $0x38] sm:$0xff] }
 0x574   : > { %1560 = vmatprep.mubr.msk.f32.mxu1 %vm769_vm9, %v1354_v35 }
 0x577   : > { %v757_v1 = vpop.permute.xlu1 %756 }
 0x57b   : > { %v762_v13 = vpop.permute.xlu1 %761 }
 0x642   : > { %v1502_v2 = vpop.f32.mrb[0].mxu1 }
 0x643   : > { %v854_v3 = vadd.f32 %v1502_v2, %v757_v1  ;;  %v848_v4 = vpop.f32.mrb[1].mxu1 }
 0x644   : > { %v849_v6 = vadd.f32 %v848_v4, %v752_v0 }
 0x645   : > { %v2094_v8 = vadd.f32 %v854_v3, %v2025_v12 }
 0x646   : > { %v2097_v9 = vadd.f32 %v849_v6, %v2027_v14  ;;  %v1505_v11 = vpop.f32.mrb[2].mxu1 }
 0x647   : > { %v864_v15 = vadd.f32 %v1505_v11, %v767_v10  ;;  %v858_v16 = vpop.f32.mrb[3].mxu1  ;;  %vm873_vm10 = vcmp.ge.f32.partialorder %v2094_v8, 0.0  ;;  %v878_v17 = vmul.f32 %v876_v7, %v2094_v8 }
 0x648   : > { %v859_v18 = vadd.f32 %v858_v16, %v762_v13  ;;  %vm872_vm11 = vcmp.ge.f32.partialorder %v2097_v9, 0.0  ;;  %v877_v20 = vmul.f32 %v876_v7, %v2097_v9 }
 0x649   : > { %v2104_v12 = vadd.f32 %v864_v15, %v2033_v19  ;;  %v882_v14 = vsel %vm873_vm10, %v2094_v8, %v878_v17 }
 0x64a   : > { %v2108_v21 = vadd.f32 %v859_v18, %v2036_v22  ;;  %v886_v23 = vmul.f32 %v1976_v28, %v882_v14  ;;  %v881_v24 = vsel %vm872_vm11, %v2097_v9, %v877_v20 }
 0x64b   : > { %v885_v25 = vmul.f32 %v1976_v28, %v881_v24  ;;  %vm875_vm12 = vcmp.ge.f32.partialorder %v2104_v12, 0.0  ;;  %v880_v26 = vmul.f32 %v876_v7, %v2104_v12 }
 0x64c   : > { %901 = vrot.lane.b32.xlu0 %v886_v23, %s1821_s21  ;;  %vm874_vm13 = vcmp.ge.f32.partialorder %v2108_v21, 0.0  ;;  %v879_v19 = vmul.f32 %v876_v7, %v2108_v21  ;;  %v1049_v7 = vstv %s1353_s25  ;;  %s2223_s25 = scalar_lea.hbm %s2279_s8, %s1372_s22 }
 0x64d   : > { %899 = vrot.lane.b32.xlu1 %v885_v25, %s1821_s21  ;;  %v884_v22 = vsel %vm875_vm12, %v2104_v12, %v880_v26  ;;  %v1618_v29 = vpack.c.bf16 %v886_v23, %v885_v25 }
 0x64e   : > { %v888_v30 = vmul.f32 %v1976_v28, %v884_v22  ;;  %v883_v31 = vsel %vm874_vm13, %v2108_v21, %v879_v19 }
 0x64f   : > { %v887_v32 = vmul.f32 %v1976_v28, %v883_v31 }
 0x650   : > { %905 = vrot.lane.b32.xlu0 %v888_v30, %s1821_s21 }
 0x651   : > { %903 = vrot.lane.b32.xlu1 %v887_v32, %s1821_s21  ;;  %v1622_v33 = vpack.c.bf16 %v888_v30, %v887_v32  ;;  %s312_s21 = scalar_lea.vmem [#allocation5], %s1316_s19 }
 0x654   : > { %913 = vrot.lane.b32.xlu0 %v886_v23, %s1822_s20 }
 0x655   : > { %911 = vrot.lane.b32.xlu1 %v885_v25, %s1822_s20 }
 0x658   : > { %917 = vrot.lane.b32.xlu0 %v888_v30, %s1822_s20 }
 0x659   : > { %915 = vrot.lane.b32.xlu1 %v887_v32, %s1822_s20  ;;  %s1236_s20 = sshll.u32 %s312_s21, 4  ;;  %s2225_s20 = int_to_ptr.vmem [resolvable:$true] %s1236_s20 }
 0x65c   : > { %930 = vperm.xlu0 %1729, %v1346_v34   ;;  %v1359_v34 = vld [vmem:[%s2278_s7 + $0x48] sm:$0xff] }
 0x65d   : > { %925 = vperm.xlu1 %1728, %v1345_v36   ;;  %v1361_v36 = vld [vmem:[%s2278_s7 + $0x58] sm:$0xff] }
 0x660   : > { %940 = vperm.xlu0 %1729, %v1348_v37   ;;  %v1360_v37 = vld [vmem:[%s2278_s7 + $0x50] sm:$0xff] }
 0x661   : > { %935 = vperm.xlu1 %1728, %v1347_v38   ;;  %v1320_v38 = vsel %vm323_vm4, 1.0, %v1817_v27 }
 0x6be   : > { %v902_v40 = vpop.permute.xlu0 %901 }
 0x6bf   : > { %v908_v41 = vmul.f32 %v1321_v39, %v902_v40  ;;  %v900_v42 = vpop.permute.xlu1 %899 }
 0x6c0   : > { %v907_v43 = vmul.f32 %v1321_v39, %v900_v42 }
 0x6c2   : > { %v1610_v44 = vpack.c.bf16 %v908_v41, %v907_v43  ;;  %v906_v45 = vpop.permute.xlu0 %905 }
 0x6c3   : > { %v910_v46 = vmul.f32 %v1321_v39, %v906_v45  ;;  %v904_v47 = vpop.permute.xlu1 %903 }
 0x6c4   : > { %v909_v48 = vmul.f32 %v1321_v39, %v904_v47  ;;  %1611 = vmatprep.subr.bf16.mxu0 %v1610_v44 }
 0x6c5   : > { %1613 = vmatpush3.bf16.msra.mxu0 %v1610_v44 }
 0x6c6   : > { %v1614_v49 = vpack.c.bf16 %v910_v46, %v909_v48  ;;  %v914_v50 = vpop.permute.xlu0 %913 }
 0x6c7   : > { %v912_v51 = vpop.permute.xlu1 %911  ;;  %v920_v53 = vmul.f32 %v1324_v52, %v914_v50 }
 0x6c8   : > { %1615 = vmatprep.subr.bf16.mxu0 %v1614_v49  ;;  %v919_v54 = vmul.f32 %v1324_v52, %v912_v51  ;;  %v1325_v51 = vsel %vm338_vm5, 1.0, %v1817_v27  ;;  %v1355_v27 = vld [vmem:[%s2277_s6 + $0x48] sm:$0xff] }
 0x6c9   : > { %1617 = vmatpush3.bf16.msra.mxu0 %v1614_v49 }
 0x6ca   : > { %1619 = vmatprep.subr.bf16.mxu0 %v1618_v29  ;;  %v918_v55 = vpop.permute.xlu0 %917  ;;  %v1626_v58 = vpack.c.bf16 %v920_v53, %v919_v54 }
 0x6cb   : > { %v916_v57 = vpop.permute.xlu1 %915  ;;  %v922_v59 = vmul.f32 %v1324_v52, %v918_v55 }
 0x6cc   : > { %v921_v56 = vmul.f32 %v1324_v52, %v916_v57 }
 0x6cd   : > { %1621 = vmatpush3.bf16.msra.mxu0 %v1618_v29 }
 0x6ce   : > { %1623 = vmatprep.subr.bf16.mxu0 %v1622_v33  ;;  %v1630_v60 = vpack.c.bf16 %v922_v59, %v921_v56  ;;  %v1356_v56 = vld [vmem:[%s2277_s6 + $0x50] sm:$0xff] }
 0x6d1   : > { %1625 = vmatpush3.bf16.msra.mxu0 %v1622_v33 }
 0x6d2   : > { %1627 = vmatprep.subr.bf16.mxu0 %v1626_v58 }
 0x6d5   : > { %1629 = vmatpush3.bf16.msra.mxu0 %v1626_v58 }
 0x6d6   : > { %1631 = vmatprep.subr.bf16.mxu0 %v1630_v60 }
 0x6d9   : > { %1633 = vmatpush3.bf16.msra.mxu0 %v1630_v60  ;;  %v1357_v60 = vld [vmem:[%s2277_s6 + $0x58] sm:$0xff] }
 0x6db   : > { %v931_v0 = vpop.permute.xlu0 %930 }
 0x6dc   : > { %1531 = vmatmul.mubr.msk.f32.vlgmr.msra.gmra.mrb[10].mxu0 %vm769_vm9, %v1342_v61  ;;  %v926_v1 = vpop.permute.xlu1 %925 }
 0x6dd   : > { %1533 = vmatprep.mubr.msk.f32.mxu0 %vm769_vm9, %v1343_v63 }
 0x6df   : > { %v941_v11 = vpop.permute.xlu0 %940 }
 0x6e0   : > { %1534 = vmatmul.mubr.msk.f32.gmra.mrb[12].mxu0 %vm769_vm9, %v1344_v62  ;;  %v936_v16 = vpop.permute.xlu1 %935 }
 0x7af   : > { %v1532_v2 = vpop.f32.mrb[10].mxu0 }
 0x7b0   : > { %v1027_v3 = vadd.f32 %v1532_v2, %v931_v0  ;;  %v1021_v4 = vpop.f32.mrb[11].mxu0 }
 0x7b1   : > { %v1022_v6 = vadd.f32 %v1021_v4, %v926_v1 }
 0x7b2   : > { %v2154_v10 = vadd.f32 %v1027_v3, %v2094_v8 }
 0x7b3   : > { %v2157_v13 = vadd.f32 %v1022_v6, %v2097_v9  ;;  %v1535_v15 = vpop.f32.mrb[12].mxu0 }
 0x7b4   : > { %v1037_v17 = vadd.f32 %v1535_v15, %v941_v11  ;;  %v1031_v18 = vpop.f32.mrb[13].mxu0  ;;  %vm1046_vm0 = vcmp.ge.f32.partialorder %v2154_v10, 0.0  ;;  %v1051_v20 = vmul.f32 %v1049_v7, %v2154_v10 }
 0x7b5   : > { %v1032_v14 = vadd.f32 %v1031_v18, %v936_v16  ;;  %vm1045_vm1 = vcmp.ge.f32.partialorder %v2157_v13, 0.0  ;;  %v1050_v23 = vmul.f32 %v1049_v7, %v2157_v13 }
 0x7b6   : > { %v2164_v8 = vadd.f32 %v1037_v17, %v2104_v12  ;;  %v1055_v24 = vsel %vm1046_vm0, %v2154_v10, %v1051_v20 }
 0x7b7   : > { %v2168_v9 = vadd.f32 %v1032_v14, %v2108_v21  ;;  %v1059_v25 = vmul.f32 %v1976_v28, %v1055_v24  ;;  %v1054_v26 = vsel %vm1045_vm1, %v2157_v13, %v1050_v23 }
 0x7b8   : > { %v1058_v19 = vmul.f32 %v1976_v28, %v1054_v26  ;;  %vm1048_vm2 = vcmp.ge.f32.partialorder %v2164_v8, 0.0  ;;  %v1053_v22 = vmul.f32 %v1049_v7, %v2164_v8 }
 0x7b9   : > { %1074 = vrot.lane.b32.xlu0 %v1059_v25, %s1823_s17  ;;  %vm1047_vm3 = vcmp.ge.f32.partialorder %v2168_v9, 0.0  ;;  %v1052_v12 = vmul.f32 %v1049_v7, %v2168_v9 }
 0x7ba   : > { %1072 = vrot.lane.b32.xlu1 %v1058_v19, %s1823_s17  ;;  %v1057_v21 = vsel %vm1048_vm2, %v2164_v8, %v1053_v22  ;;  %v1642_v29 = vpack.c.bf16 %v1059_v25, %v1058_v19 }
 0x7bb   : > { %v1061_v30 = vmul.f32 %v1976_v28, %v1057_v21  ;;  %v1056_v31 = vsel %vm1047_vm3, %v2168_v9, %v1052_v12 }
 0x7bc   : > { %v1060_v32 = vmul.f32 %v1976_v28, %v1056_v31  ;;  %v1358_v28 = vld [vmem:[%s2278_s7 + $0x40] sm:$0xff] }
 0x7bd   : > { %1078 = vrot.lane.b32.xlu0 %v1061_v30, %s1823_s17 }
 0x7be   : > { %1076 = vrot.lane.b32.xlu1 %v1060_v32, %s1823_s17  ;;  %v1646_v33 = vpack.c.bf16 %v1061_v30, %v1060_v32  ;;  %s1747_s17 = scalar_lea.vmem %s2225_s20, 512 }
 0x7bf   : > { %p1748_p9 = scmp.ne.s32.totalorder %s2225_s20, %s1747_s17 }
 0x7c1   : > { %1086 = vrot.lane.b32.xlu0 %v1059_v25, %s1824_s26  ;;  %p1749_p10 = pnand %p1748_p9, %p1911_p5 }
 0x7c2   : > { %1084 = vrot.lane.b32.xlu1 %v1058_v19, %s1824_s26 }
 0x7c3   : > { %p1750_p12 = pneg %p1749_p10 }
 0x7c5   : > { %1090 = vrot.lane.b32.xlu0 %v1061_v30, %s1824_s26 }
 0x7c6   : > { %1088 = vrot.lane.b32.xlu1 %v1060_v32, %s1824_s26  ;;  %s1825_s26 = smov [#allocation5]  }
 0x7c7   : > { %s1751_s10 = sshll.u32 %s1825_s26, 4  ;;  %s1752_s10 = int_to_ptr.vmem [resolvable:$false] %s1751_s10 }
 0x7c8   : > { %s1753_s12 = scalar_lea.vmem %s1752_s10, 1024  ;;  %p1754_p13 = scmp.lt.s32.totalorder %s2225_s20, %s1752_s10 }
 0x7c9   : > { %1103 = vperm.xlu0 %1729, %v1359_v34   ;;  %p1755_p0 = scmp.lt.s32.totalorder %s1753_s12, %s1747_s17 }
 0x7ca   : > { %1098 = vperm.xlu1 %1728, %v1358_v28  }
 0x7cb   : > { %p1756_p1 = por %p1755_p0, %p1754_p13 }
 0x7cd   : > { %1113 = vperm.xlu0 %1729, %v1361_v36   ;;  %p1757_p2 = pnand %p1756_p1, %p1750_p12 }
 0x7ce   : > { %1108 = vperm.xlu1 %1728, %v1360_v37  }
 0x82b   : > { %v1075_v39 = vpop.permute.xlu0 %1074 }
 0x82c   : > { %v1081_v40 = vmul.f32 %v1320_v38, %v1075_v39  ;;  %v1073_v41 = vpop.permute.xlu1 %1072 }
 0x82d   : > { %v1080_v42 = vmul.f32 %v1320_v38, %v1073_v41 }
 0x82f   : > { %v1634_v43 = vpack.c.bf16 %v1081_v40, %v1080_v42  ;;  %v1079_v44 = vpop.permute.xlu0 %1078 }
 0x830   : > { %v1083_v45 = vmul.f32 %v1320_v38, %v1079_v44  ;;  %v1077_v46 = vpop.permute.xlu1 %1076 }
 0x831   : > { %v1082_v47 = vmul.f32 %v1320_v38, %v1077_v46  ;;  %1635 = vmatprep.subr.bf16.mxu1 %v1634_v43 }
 0x832   : > { %1637 = vmatpush3.bf16.msra.mxu1 %v1634_v43 }
 0x833   : > { %v1638_v48 = vpack.c.bf16 %v1083_v45, %v1082_v47  ;;  %v1087_v49 = vpop.permute.xlu0 %1086 }
 0x834   : > { %v1085_v50 = vpop.permute.xlu1 %1084  ;;  %v1093_v52 = vmul.f32 %v1325_v51, %v1087_v49 }
 0x835   : > { %1639 = vmatprep.subr.bf16.mxu1 %v1638_v48  ;;  %v1092_v53 = vmul.f32 %v1325_v51, %v1085_v50 }
 0x836   : > { %1641 = vmatpush3.bf16.msra.mxu1 %v1638_v48 }
 0x837   : > { %1643 = vmatprep.subr.bf16.mxu1 %v1642_v29  ;;  %v1091_v54 = vpop.permute.xlu0 %1090  ;;  %v1650_v57 = vpack.c.bf16 %v1093_v52, %v1092_v53 }
 0x838   : > { %v1089_v55 = vpop.permute.xlu1 %1088  ;;  %v1095_v58 = vmul.f32 %v1325_v51, %v1091_v54 }
 0x839   : > { %v1094_v59 = vmul.f32 %v1325_v51, %v1089_v55 }
 0x83a   : > { %1645 = vmatpush3.bf16.msra.mxu1 %v1642_v29 }
 0x83b   : > { %1647 = vmatprep.subr.bf16.mxu1 %v1646_v33  ;;  %v1654_v5 = vpack.c.bf16 %v1095_v58, %v1094_v59 }
 0x83e   : > { %1649 = vmatpush3.bf16.msra.mxu1 %v1646_v33 }
 0x83f   : > { %1651 = vmatprep.subr.bf16.mxu1 %v1650_v57 }
 0x842   : > { %1653 = vmatpush3.bf16.msra.mxu1 %v1650_v57 }
 0x843   : > { %1655 = vmatprep.subr.bf16.mxu1 %v1654_v5 }
 0x846   : > { %1657 = vmatpush3.bf16.msra.mxu1 %v1654_v5 }
 0x848   : > { %v1104_v61 = vpop.permute.xlu0 %1103 }
 0x849   : > { %1561 = vmatmul.mubr.msk.f32.vlgmr.msra.gmra.mrb[4].mxu1 %vm769_vm9, %v1355_v27  ;;  %v1099_v63 = vpop.permute.xlu1 %1098 }
 0x84a   : > { %1563 = vmatprep.mubr.msk.f32.mxu1 %vm769_vm9, %v1356_v56 }
 0x84c   : > { %v1114_v4 = vpop.permute.xlu0 %1113 }
 0x84d   : > { %1564 = vmatmul.mubr.msk.f32.gmra.mrb[6].mxu1 %vm769_vm9, %v1357_v60  ;;  %v1109_v11 = vpop.permute.xlu1 %1108 }
 0x91c   : > { %v1562_v62 = vpop.f32.mrb[4].mxu1 }
 0x91d   : > { %v1200_v0 = vadd.f32 %v1562_v62, %v1104_v61  ;;  %v1194_v1 = vpop.f32.mrb[5].mxu1 }
 0x91e   : > { %v1195_v2 = vadd.f32 %v1194_v1, %v1099_v63 }
 0x91f   : > { %v1214_v3 = vadd.f32 %v1200_v0, %v2154_v10 }
 0x920   : > { %v1213_v6 = vadd.f32 %v1195_v2, %v2157_v13  ;;  %v1565_v7 = vpop.f32.mrb[6].mxu1 }
 0x921   : > { %1219 = vst.msk [vmem:[%s312_s21 + $0x8] sm:$0xff] %vm1217_vm6, %v1214_v3  ;;  %v1210_v15 = vadd.f32 %v1565_v7, %v1114_v4  ;;  %v1204_v16 = vpop.f32.mrb[7].mxu1 }
 0x922   : > { %1218 = vst.msk [vmem:[%s312_s21] sm:$0xff] %vm1217_vm6, %v1213_v6  ;;  %v1205_v17 = vadd.f32 %v1204_v16, %v1109_v11 }
 0x923   : > { %v1216_v18 = vadd.f32 %v1210_v15, %v2164_v8 }
 0x924   : > { %v1215_v10 = vadd.f32 %v1205_v17, %v2168_v9 }
 0x925   : > { %1221 = vst.msk [vmem:[%s312_s21 + $0x18] sm:$0xff] %vm1217_vm6, %v1216_v18 }
 0x926   : > { %1220 = vst.msk [vmem:[%s312_s21 + $0x10] sm:$0xff] %vm1217_vm6, %v1215_v10 }
 0x927   : > { %1760 = shalt.err (!%p1757_p2)
}
 0x928   : > { %s1761_s13 = scalar_lea.hbm %s2223_s25, 512  ;;  %s1765_s21 = scalar_lea.hbm %s2279_s8, 1024 }
 0x929   : > { %p1762_p3 = scmp.ne.s32.totalorder %s2223_s25, %s1761_s13  ;;  %p1766_p8 = scmp.lt.u32.totalorder %s2223_s25, %s2279_s8 }
 0x92a   : > { %p1767_p11 = scmp.lt.u32.totalorder %s1765_s21, %s1761_s13  ;;  %p1769_p10 = scmp.lt.u32.totalorder %s1761_s13, %s2223_s25 }
 0x92b   : > { %p1763_p4 = pnand %p1762_p3, %p1911_p5 }
 0x92c   : > { %p1768_p9 = por %p1767_p11, %p1766_p8 }
 0x92d   : > { %p1764_p7 = pneg %p1763_p4 }
 0x92e   : > { %p1770_p12 = por %p1769_p10, %p1768_p9 }
 0x930   : > { %p1771_p13 = pnand %p1770_p12, %p1764_p7 }
 0x932   : > { %1774 = shalt.err (!%p1771_p13)
}
 0x933   : > { %s1826_s24 = smov 128   ;;  %s1827_s17 = smov 8  }
 0x934   : > { %1666 = dma.vmem_to_hbm [thread:$0]  (%p1911_p5), %s2225_s20, 512, %s2223_s25, %s2230_s9, %s1826_s24, %s1826_s24, %s1827_s17  }
 0x935 PF: > { %p1678_p0 = scmp.ge.s32.totalorder %s1813_s30, 2  ;;  %s1251_s26 = sand.u32 1, %s1801_s27  }
 0x936   : > { %s1252_s10 = scalar_lea.sflag [#allocation3], %s1251_s26 }
 0x937   : > { %p1673_p1 = pnand %p1678_p0, %p1915_p6 }
 0x939   : > { %1796 = dma.done.wait (!%p1673_p1), %s1252_s10, 512  }
 0x93a   : > { %1798 = vsyncadd (!%p1673_p1), %s1252_s10, 4294966784  ;;  %p19_p2 = scmp.ge.s32.totalorder %s1898_s11, 4   ;;  %s2283_s27 = smov %s1805_s28 }
 0x93b   : > { %s2284_s28 = smov %s1809_s29  ;;  %s2285_s29 = smov %s1909_s14 }
 0x93c   : > { %s2286_s30 = smov %s1898_s11  ;;  %21 = sbr.rel (!%p19_p2) target bundleno = 4 (0x4), region = 96 }
 0x943   :  { %1257 = vsyncpa [#allocation3], 1 }
 0x944   :  { %1259 = vsyncpa [#allocation3 + $0x1], 1 }
 0x945   :  { %1260 = vsyncpa [#allocation4], 1 }
 0x946   :  { %1262 = vsyncpa [#allocation4 + $0x1], 1 }

</bundles_post_ra>
